<compile_context>
chip_gen: v6e
topology: v6e:2x2x1
jax: 0.10.0
libtpu: 0.0.40
codegen_flags: <defaults>
</compile_context>

<pallas_src>
import jax
import jax.numpy as jnp
from jax.experimental import pallas as pl
from jax.experimental.pallas import tpu as pltpu

_LANE = 128
_HEAD_HIDDEN = 200        # per the PyTorch spec: Linear(h, 200) -> Linear(200, 1)
_OUT_PAD = _LANE          # lane-dense output block; only first 3 lanes meaningful
_FOLD_MAX_S = 16          # fold mean-pool into the weight only for short sequences


def _round_up(x, m):
    return ((x + m - 1) // m) * m


# ----------------------------------------------------------------------------
# Fused kernel (one grid step = one batch tile):
#   t/v/a   : [bt, t_dim] / [bt, Kv] / [bt, a_dim]   bf16 activations
#   wt/wv/wa: [*, H3P] block-diagonal (columns per modality), bf16
#   b_fuse  : [1, H3P] f32
#   w_head  : [H3P, 128] f32 (folded w1@w2 per head in cols 0..2, rest zero)
#   b_head  : [1, 128]  f32
#   out     : [bt, 128] f32, lanes (0,1,2) = (out_t, out_v, out_a)
# ----------------------------------------------------------------------------
def fmoe_fused_kernel(t_ref, v_ref, a_ref,
                      wt_ref, wv_ref, wa_ref, b_fuse_ref,
                      w_head_ref, b_head_ref, o_ref):
    acc = jnp.dot(t_ref[...], wt_ref[...], preferred_element_type=jnp.float32)
    acc = acc + jnp.dot(v_ref[...], wv_ref[...], preferred_element_type=jnp.float32)
    acc = acc + jnp.dot(a_ref[...], wa_ref[...], preferred_element_type=jnp.float32)
    h = jnp.maximum(acc + b_fuse_ref[...], 0.0)                       # [bt, H3P]
    o_ref[...] = (jnp.dot(h, w_head_ref[...],
                          preferred_element_type=jnp.float32)
                  + b_head_ref[...])                                  # [bt, 128]


def _pick_batch_tile(B):
    # TODO(synk): for very large batches, re-derive the tile from the v7x 64 MiB
    # VMEM budget (2 pipeline buffers x (x_tile + out_tile) + resident weights).
    if B >= 512:
        return 512
    if B >= 256:
        return 256
    if B >= 128:
        return 128
    return _round_up(max(B, 1), 8)


def fmoe_forward_first_stage(v_f_seq, t_f, a_f, fused):
    B, S, v_dim = v_f_seq.shape
    t_dim = t_f.shape[-1]
    a_dim = a_f.shape[-1]
    H3P = fused["w_head"].shape[0]

    if fused["fold_visual_mean"]:
        v_in = v_f_seq.reshape(B, S * v_dim)          # free row-major reshape
    else:
        v_in = jnp.mean(v_f_seq, axis=1)              # pool long sequences outside
    k_v = v_in.shape[-1]

    # bf16 activations: halves input HBM traffic; MXU accumulates in f32.
    t_in = t_f.astype(jnp.bfloat16)
    v_in = v_in.astype(jnp.bfloat16)
    a_in = a_f.astype(jnp.bfloat16)

    b_tile = _pick_batch_tile(B)
    b_pad = _round_up(B, b_tile)
    if b_pad != B:
        pad = lambda x: jnp.pad(x, ((0, b_pad - B), (0, 0)))
        t_in, v_in, a_in = pad(t_in), pad(v_in), pad(a_in)

    grid = (b_pad // b_tile,)
    row = lambda i: (i, 0)      # per-batch-tile blocks
    fixed = lambda i: (0, 0)    # weights/biases: one full-extent block, resident

    in_specs = [
        pl.BlockSpec((b_tile, t_dim), row),
        pl.BlockSpec((b_tile, k_v), row),
        pl.BlockSpec((b_tile, a_dim), row),
        pl.BlockSpec((t_dim, H3P), fixed),
        pl.BlockSpec((k_v, H3P), fixed),
        pl.BlockSpec((a_dim, H3P), fixed),
        pl.BlockSpec((1, H3P), fixed),
        pl.BlockSpec((H3P, _OUT_PAD), fixed),
        pl.BlockSpec((1, _OUT_PAD), fixed),
    ]
    out_specs = pl.BlockSpec((b_tile, _OUT_PAD), row)

    args = (t_in, v_in, a_in,
            fused["wt"], fused["wv"], fused["wa"], fused["b_fuse"],
            fused["w_head"], fused["b_head"])

    weight_bytes = sum(int(a.size) * a.dtype.itemsize for a in args[3:])
    tile_bytes = (b_tile * (t_dim + k_v + a_dim) * 2        # bf16 input tile
                  + b_tile * _OUT_PAD * 4)                  # f32 output tile
    vmem_limit = int(min(max(weight_bytes + 2 * tile_bytes + (2 << 20), 4 << 20),
                         48 << 20))

    k_total = t_dim + k_v + a_dim
    flops = 2 * b_pad * (k_total * H3P + H3P * _OUT_PAD)
    bytes_accessed = (sum(int(a.size) * a.dtype.itemsize for a in args)
                      + b_pad * _OUT_PAD * 4)

    out = pl.pallas_call(
        fmoe_fused_kernel,
        out_shape=jax.ShapeDtypeStruct((b_pad, _OUT_PAD), jnp.float32),
        grid=grid,
        in_specs=in_specs,
        out_specs=out_specs,
        compiler_params=pltpu.CompilerParams(
            dimension_semantics=("parallel",),
            vmem_limit_bytes=vmem_limit),
        cost_estimate=pl.CostEstimate(flops=flops, transcendentals=0,
                                      bytes_accessed=bytes_accessed),
    )(*args)

    out = out[:B]
    return out[:, 0:1], out[:, 1:2], out[:, 2:3]


# ----------------------------------------------------------------------------
# Parameter construction
# ----------------------------------------------------------------------------
def init_raw_params(key, v_dim, t_dim, a_dim, h_dim):
    ks = jax.random.split(key, 9)

    def lin(k, fan_in, fan_out):
        kw, kb = jax.random.split(k)
        w = jax.random.normal(kw, (fan_in, fan_out), jnp.float32) / jnp.sqrt(fan_in)
        b = jax.random.normal(kb, (1, fan_out), jnp.float32) * 0.01
        return w, b

    wt, bt = lin(ks[0], t_dim, h_dim)
    wv, bv = lin(ks[1], v_dim, h_dim)
    wa, ba = lin(ks[2], a_dim, h_dim)

    def head(k1, k2):
        w1, b1 = lin(k1, h_dim, _HEAD_HIDDEN)
        w2, b2 = lin(k2, _HEAD_HIDDEN, 1)
        return (w1, b1, w2, b2)

    return {
        "wt": wt, "bt": bt, "wv": wv, "bv": bv, "wa": wa, "ba": ba,
        "head_t": head(ks[3], ks[4]),
        "head_v": head(ks[5], ks[6]),
        "head_a": head(ks[7], ks[8]),
    }


def build_fused_params(raw, S, v_dim, t_dim, a_dim, h_dim):
    """Block-diagonal / mean-pool-folded / head-folded weights (done once at init)."""
    H3 = 3 * h_dim
    H3P = _round_up(H3, _LANE)                 # 96 -> 128 (lane-dense fuse output)
    fold = S <= _FOLD_MAX_S

    def col_block(w, col0):
        out = jnp.zeros((w.shape[0], H3P), jnp.float32)
        return out.at[:, col0:col0 + h_dim].set(w)

    wt = col_block(raw["wt"], 0)
    if fold:
        # Mean over S folded into the weight (removes the XLU cross-lane reduce).
        wv_eff = jnp.tile(raw["wv"], (S, 1)) / float(S)
    else:
        wv_eff = raw["wv"]
    wv = col_block(wv_eff, h_dim)
    wa = col_block(raw["wa"], 2 * h_dim)

    b_fuse = jnp.zeros((1, H3P), jnp.float32)
    b_fuse = b_fuse.at[0, 0:h_dim].set(raw["bt"][0])
    b_fuse = b_fuse.at[0, h_dim:2 * h_dim].set(raw["bv"][0])
    b_fuse = b_fuse.at[0, 2 * h_dim:3 * h_dim].set(raw["ba"][0])

    # Heads: no activation between the two Linears -> fold them at init.
    w_head = jnp.zeros((H3P, _OUT_PAD), jnp.float32)
    b_head = jnp.zeros((1, _OUT_PAD), jnp.float32)
    for i, (w1, b1, w2, b2) in enumerate(
            (raw["head_t"], raw["head_v"], raw["head_a"])):
        w_head = w_head.at[i * h_dim:(i + 1) * h_dim, i].set((w1 @ w2)[:, 0])
        b_head = b_head.at[0, i].set((b1 @ w2 + b2)[0, 0])

    return {"wt": wt.astype(jnp.bfloat16),
            "wv": wv.astype(jnp.bfloat16),
            "wa": wa.astype(jnp.bfloat16),
            "b_fuse": b_fuse,
            "w_head": w_head, "b_head": b_head,
            "fold_visual_mean": fold}


# ----------------------------------------------------------------------------
# Pure-JAX f32 reference (same stand-in semantics) for correctness checking
# ----------------------------------------------------------------------------
def reference_forward(v_f_seq, t_f, a_f, raw):
    v_mean = jnp.mean(v_f_seq, axis=1)
    T = jax.nn.relu(t_f @ raw["wt"] + raw["bt"])
    V = jax.nn.relu(v_mean @ raw["wv"] + raw["bv"])
    A = jax.nn.relu(a_f @ raw["wa"] + raw["ba"])

    def head(x, w1, b1, w2, b2):
        return (x @ w1 + b1) @ w2 + b2

    return head(T, *raw["head_t"]), head(V, *raw["head_v"]), head(A, *raw["head_a"])


if __name__ == "__main__":
    B, S = 2, 8
    v_dim, t_dim, a_dim, h_dim = 16, 20, 12, 32   # S*v_dim = 128 (MXU-aligned K)

    key = jax.random.PRNGKey(0)
    k_v, k_t, k_a, k_p = jax.random.split(key, 4)

    v_f_seq = jax.random.normal(k_v, (B, S, v_dim), jnp.float32)
    t_f = jax.random.normal(k_t, (B, t_dim), jnp.float32)
    a_f = jax.random.normal(k_a, (B, a_dim), jnp.float32)

    raw = init_raw_params(k_p, v_dim, t_dim, a_dim, h_dim)
    fused = build_fused_params(raw, S, v_dim, t_dim, a_dim, h_dim)

    fwd = jax.jit(lambda v, t, a: fmoe_forward_first_stage(v, t, a, fused))
    out_t, out_v, out_a = fwd(v_f_seq, t_f, a_f)
    jax.block_until_ready((out_t, out_v, out_a))

    assert out_t.shape == (B, 1) and out_v.shape == (B, 1) and out_a.shape == (B, 1)

    # Correctness vs. pure-f32 reference; bf16 activations/fuse weights in the
    # kernel -> loosened tolerance (structural errors would be O(1), not O(1e-2)).
    ref_t, ref_v, ref_a = reference_forward(v_f_seq, t_f, a_f, raw)
    assert jnp.allclose(out_t, ref_t, rtol=2e-2, atol=2e-2)
    assert jnp.allclose(out_v, ref_v, rtol=2e-2, atol=2e-2)
    assert jnp.allclose(out_a, ref_a, rtol=2e-2, atol=2e-2)

    print("KERNEL_OK")
</pallas_src>

<mosaic_0001>
module attributes {stable_mosaic.version = 11 : i64} {
  func.func @fmoe_fused_kernel(%arg0: i32, %arg1: memref<8x20xbf16, #tpu.memory_space<vmem>>, %arg2: memref<8x128xbf16, #tpu.memory_space<vmem>>, %arg3: memref<8x12xbf16, #tpu.memory_space<vmem>>, %arg4: memref<20x128xbf16, #tpu.memory_space<vmem>>, %arg5: memref<128x128xbf16, #tpu.memory_space<vmem>>, %arg6: memref<12x128xbf16, #tpu.memory_space<vmem>>, %arg7: memref<1x128xf32, #tpu.memory_space<vmem>>, %arg8: memref<128x128xf32, #tpu.memory_space<vmem>>, %arg9: memref<1x128xf32, #tpu.memory_space<vmem>>, %arg10: memref<8x128xf32, #tpu.memory_space<vmem>>) attributes {dimension_semantics = [#tpu.dimension_semantics<parallel>], iteration_bounds = array<i64: 1>, scalar_prefetch = 0 : i64, scratch_operands = 0 : i64, tpu.core_type = #tpu.core_type<tc>, window_params = [{transform_indices = @transform_0, window_bounds = array<i64: 8, 20>}, {transform_indices = @transform_1, window_bounds = array<i64: 8, 128>}, {transform_indices = @transform_2, window_bounds = array<i64: 8, 12>}, {pipeline_mode = #tpu.pipeline_mode<synchronous>, transform_indices = @transform_3, window_bounds = array<i64: 20, 128>}, {pipeline_mode = #tpu.pipeline_mode<synchronous>, transform_indices = @transform_4, window_bounds = array<i64: 128, 128>}, {pipeline_mode = #tpu.pipeline_mode<synchronous>, transform_indices = @transform_5, window_bounds = array<i64: 12, 128>}, {pipeline_mode = #tpu.pipeline_mode<synchronous>, transform_indices = @transform_6, window_bounds = array<i64: 1, 128>}, {pipeline_mode = #tpu.pipeline_mode<synchronous>, transform_indices = @transform_7, window_bounds = array<i64: 128, 128>}, {pipeline_mode = #tpu.pipeline_mode<synchronous>, transform_indices = @transform_8, window_bounds = array<i64: 1, 128>}, {transform_indices = @transform_9, window_bounds = array<i64: 8, 128>}]} {
    %c0 = arith.constant 0 : index
    %c0_0 = arith.constant 0 : index
    %0 = vector.load %arg1[%c0, %c0_0] : memref<8x20xbf16, #tpu.memory_space<vmem>>, vector<8x20xbf16>
    %c0_1 = arith.constant 0 : index
    %c0_2 = arith.constant 0 : index
    %1 = vector.load %arg4[%c0_1, %c0_2] : memref<20x128xbf16, #tpu.memory_space<vmem>>, vector<20x128xbf16>
    %cst = arith.constant dense<0.000000e+00> : vector<8x128xf32>
    %2 = tpu.matmul %0, %1, %cst {dimension_numbers = #tpu.dot_dimension_numbers<[1], [0], [0], [1], [0, 0, 1, 1], [], []>} : vector<8x20xbf16>, vector<20x128xbf16>, vector<8x128xf32> -> vector<8x128xf32>
    %c0_3 = arith.constant 0 : index
    %c0_4 = arith.constant 0 : index
    %3 = vector.load %arg2[%c0_3, %c0_4] : memref<8x128xbf16, #tpu.memory_space<vmem>>, vector<8x128xbf16>
    %c0_5 = arith.constant 0 : index
    %c0_6 = arith.constant 0 : index
    %4 = vector.load %arg5[%c0_5, %c0_6] : memref<128x128xbf16, #tpu.memory_space<vmem>>, vector<128x128xbf16>
    %cst_7 = arith.constant dense<0.000000e+00> : vector<8x128xf32>
    %5 = tpu.matmul %3, %4, %cst_7 {dimension_numbers = #tpu.dot_dimension_numbers<[1], [0], [0], [1], [0, 0, 1, 1], [], []>} : vector<8x128xbf16>, vector<128x128xbf16>, vector<8x128xf32> -> vector<8x128xf32>
    %6 = arith.addf %2, %5 : vector<8x128xf32>
    %c0_8 = arith.constant 0 : index
    %c0_9 = arith.constant 0 : index
    %7 = vector.load %arg3[%c0_8, %c0_9] : memref<8x12xbf16, #tpu.memory_space<vmem>>, vector<8x12xbf16>
    %c0_10 = arith.constant 0 : index
    %c0_11 = arith.constant 0 : index
    %8 = vector.load %arg6[%c0_10, %c0_11] : memref<12x128xbf16, #tpu.memory_space<vmem>>, vector<12x128xbf16>
    %cst_12 = arith.constant dense<0.000000e+00> : vector<8x128xf32>
    %9 = tpu.matmul %7, %8, %cst_12 {dimension_numbers = #tpu.dot_dimension_numbers<[1], [0], [0], [1], [0, 0, 1, 1], [], []>} : vector<8x12xbf16>, vector<12x128xbf16>, vector<8x128xf32> -> vector<8x128xf32>
    %10 = arith.addf %6, %9 : vector<8x128xf32>
    %c0_13 = arith.constant 0 : index
    %c0_14 = arith.constant 0 : index
    %11 = vector.load %arg7[%c0_13, %c0_14] : memref<1x128xf32, #tpu.memory_space<vmem>>, vector<1x128xf32>
    %12 = vector.broadcast %11 : vector<1x128xf32> to vector<8x128xf32>
    %13 = arith.addf %10, %12 : vector<8x128xf32>
    %cst_15 = arith.constant 0.000000e+00 : f32
    %14 = vector.broadcast %cst_15 : f32 to vector<8x128xf32>
    %15 = arith.maximumf %13, %14 : vector<8x128xf32>
    %c0_16 = arith.constant 0 : index
    %c0_17 = arith.constant 0 : index
    %16 = vector.load %arg8[%c0_16, %c0_17] : memref<128x128xf32, #tpu.memory_space<vmem>>, vector<128x128xf32>
    %cst_18 = arith.constant dense<0.000000e+00> : vector<8x128xf32>
    %17 = tpu.matmul %15, %16, %cst_18 {dimension_numbers = #tpu.dot_dimension_numbers<[1], [0], [0], [1], [0, 0, 1, 1], [], []>} : vector<8x128xf32>, vector<128x128xf32>, vector<8x128xf32> -> vector<8x128xf32>
    %c0_19 = arith.constant 0 : index
    %c0_20 = arith.constant 0 : index
    %18 = vector.load %arg9[%c0_19, %c0_20] : memref<1x128xf32, #tpu.memory_space<vmem>>, vector<1x128xf32>
    %19 = vector.broadcast %18 : vector<1x128xf32> to vector<8x128xf32>
    %20 = arith.addf %17, %19 : vector<8x128xf32>
    %c0_21 = arith.constant 0 : index
    %c0_22 = arith.constant 0 : index
    %21 = vector.load %arg10[%c0_21, %c0_22] : memref<8x128xf32, #tpu.memory_space<vmem>>, vector<8x128xf32>
    tpu.vector_store %arg10[%c0_21, %c0_22], %20 {strides = array<i32>} : memref<8x128xf32, #tpu.memory_space<vmem>>, vector<8x128xf32>,
    return
  }
  func.func @transform_0(%arg0: i32) -> (i32, i32) {
    %c0_i32 = arith.constant 0 : i32
    %c0_i32_0 = arith.constant 0 : i32
    return %arg0, %c0_i32 : i32, i32
  }
  func.func @transform_1(%arg0: i32) -> (i32, i32) {
    %c0_i32 = arith.constant 0 : i32
    %c0_i32_0 = arith.constant 0 : i32
    return %arg0, %c0_i32 : i32, i32
  }
  func.func @transform_2(%arg0: i32) -> (i32, i32) {
    %c0_i32 = arith.constant 0 : i32
    %c0_i32_0 = arith.constant 0 : i32
    return %arg0, %c0_i32 : i32, i32
  }
  func.func @transform_3(%arg0: i32) -> (i32, i32) {
    %c0_i32 = arith.constant 0 : i32
    %c0_i32_0 = arith.constant 0 : i32
    %c0_i32_1 = arith.constant 0 : i32
    return %c0_i32, %c0_i32_0 : i32, i32
  }
  func.func @transform_4(%arg0: i32) -> (i32, i32) {
    %c0_i32 = arith.constant 0 : i32
    %c0_i32_0 = arith.constant 0 : i32
    %c0_i32_1 = arith.constant 0 : i32
    return %c0_i32, %c0_i32_0 : i32, i32
  }
  func.func @transform_5(%arg0: i32) -> (i32, i32) {
    %c0_i32 = arith.constant 0 : i32
    %c0_i32_0 = arith.constant 0 : i32
    %c0_i32_1 = arith.constant 0 : i32
    return %c0_i32, %c0_i32_0 : i32, i32
  }
  func.func @transform_6(%arg0: i32) -> (i32, i32) {
    %c0_i32 = arith.constant 0 : i32
    %c0_i32_0 = arith.constant 0 : i32
    %c0_i32_1 = arith.constant 0 : i32
    return %c0_i32, %c0_i32_0 : i32, i32
  }
  func.func @transform_7(%arg0: i32) -> (i32, i32) {
    %c0_i32 = arith.constant 0 : i32
    %c0_i32_0 = arith.constant 0 : i32
    %c0_i32_1 = arith.constant 0 : i32
    return %c0_i32, %c0_i32_0 : i32, i32
  }
  func.func @transform_8(%arg0: i32) -> (i32, i32) {
    %c0_i32 = arith.constant 0 : i32
    %c0_i32_0 = arith.constant 0 : i32
    %c0_i32_1 = arith.constant 0 : i32
    return %c0_i32, %c0_i32_0 : i32, i32
  }
  func.func @transform_9(%arg0: i32) -> (i32, i32) {
    %c0_i32 = arith.constant 0 : i32
    %c0_i32_0 = arith.constant 0 : i32
    return %arg0, %c0_i32 : i32, i32
  }
}

</mosaic_0001>

<bundles_post_ra>
// kernel: _lambda_.1
= control target key start
LH: loop header
LB: loop body
LE: loop exit
PB: predicated region body
PF: predicated region fallthrough
CT: control target
= control target key end

     0   :  { %14 = vsyncpa [#allocation3], 0  ;;  %s750_s0 = inlined_call_operand.vmem [shape: bf16[8,20], index: 0, kind: input, shape index: {}]   ;;  %s751_s1 = inlined_call_operand.vmem [shape: bf16[8,128], index: 1, kind: input, shape index: {}]   ;;  %s752_s2 = inlined_call_operand.vmem [shape: bf16[8,12], index: 2, kind: input, shape index: {}]   ;;  %s753_s3 = inlined_call_operand.hbm [shape: bf16[20,128], index: 3, kind: input, shape index: {}]   ;;  %s754_s4 = inlined_call_operand.vmem [shape: bf16[128,128], index: 4, kind: input, shape index: {}]   ;;  %s755_s5 = inlined_call_operand.hbm [shape: bf16[12,128], index: 5, kind: input, shape index: {}]   ;;  %s756_s6 = inlined_call_operand.vmem [shape: f32[1,128], index: 6, kind: input, shape index: {}]   ;;  %s757_s7 = inlined_call_operand.hbm [shape: f32[128,128], index: 7, kind: input, shape index: {}]   ;;  %s758_s8 = inlined_call_operand.vmem [shape: f32[1,128], index: 8, kind: input, shape index: {}]   ;;  %s759_s9 = inlined_call_operand.vmem [shape: f32[8,128], index: 9, kind: output, shape index: {}]  }
   0x1   :  { %15 = vsyncpa [#allocation5], 0  ;;  %s605_s30 = smov [#allocation4]   ;;  %s606_s11 = smov [#allocation2]  }
   0x2   :  { %s41_s10 = sshll.u32 %s605_s30, 4  ;;  %s27_s12 = sshll.u32 %s606_s11, 4  ;;  %s42_s10 = int_to_ptr.vmem [resolvable:$true] %s41_s10  ;;  %s28_s12 = int_to_ptr.vmem [resolvable:$true] %s27_s12 }
   0x3   :  { %s549_s13 = scalar_lea.vmem %s42_s10, 128  ;;  %p554_p1 = scmp.lt.s32.totalorder %s42_s10, %s42_s10 }
   0x4   :  { %p550_p0 = scmp.ne.s32.totalorder %s42_s10, %s549_s13  ;;  %p555_p2 = scmp.lt.s32.totalorder %s549_s13, %s549_s13 }
   0x6   :  { %p556_p3 = por %p555_p2, %p554_p1 }
   0x8   :  { %p557_p4 = pnand %p556_p3, %p550_p0 }
   0xa   :  { %560 = shalt.err (!%p557_p4)
}
   0xb   :  { %s607_s14 = smov 64   ;;  %s608_s15 = smov 4  }
   0xc   :  { %47 = dma.hbm_to_vmem [thread:$0]  %s755_s5, 128, %s42_s10, [#allocation5], %s607_s14, %s607_s14, %s608_s15  }
   0xd   :  { %s569_s18 = scalar_lea.vmem %s28_s12, 192  ;;  %p574_p6 = scmp.lt.s32.totalorder %s28_s12, %s28_s12 }
   0xe   :  { %p570_p5 = scmp.ne.s32.totalorder %s28_s12, %s569_s18  ;;  %p575_p7 = scmp.lt.s32.totalorder %s569_s18, %s569_s18 }
  0x10   :  { %p576_p8 = por %p575_p7, %p574_p6 }
  0x12   :  { %p577_p9 = pnand %p576_p8, %p570_p5 }
  0x14   :  { %580 = shalt.err (!%p577_p9)
}
  0x15   :  { %33 = dma.hbm_to_vmem [thread:$0]  %s753_s3, 192, %s28_s12, [#allocation3], %s607_s14, %s607_s14, %s608_s15  }
  0x16   :  { %s609_s21 = smov [#allocation6]  }
  0x17   :  { %s55_s22 = sshll.u32 %s609_s21, 4  ;;  %s56_s22 = int_to_ptr.vmem [resolvable:$true] %s55_s22 }
  0x18   :  { %s589_s23 = scalar_lea.vmem %s56_s22, 2048  ;;  %p594_p11 = scmp.lt.s32.totalorder %s56_s22, %s56_s22 }
  0x19   :  { %p590_p10 = scmp.ne.s32.totalorder %s56_s22, %s589_s23  ;;  %p595_p12 = scmp.lt.s32.totalorder %s589_s23, %s589_s23 }
  0x1b   :  { %p596_p13 = por %p595_p12, %p594_p11 }
  0x1d   :  { %p597_p0 = pnand %p596_p13, %p590_p10 }
  0x1f   :  { %600 = shalt.err (!%p597_p0)
}
  0x20   :  { %s610_s5 = smov 128   ;;  %s611_s24 = smov 8  }
  0x21   :  { %61 = dma.hbm_to_vmem [thread:$0]  %s757_s7, 2048, %s56_s22, [#allocation5], %s610_s5, %s610_s5, %s611_s24  }
  0x22   :  { %601 = dma.done.wait [#allocation3], 192  }
  0x23   :  { %602 = vsyncadd [#allocation3], 4294967104 }
  0x24   :  { %603 = dma.done.wait [#allocation5], 2176  }
  0x25   :  { %604 = vsyncadd [#allocation5], 4294965120  ;;  %v612_v0 = vmov 0.0   ;;  %vm613_vm0 = vmmov 0   ;;  %v530_v1 = vld [vmem:[%s754_s4 + $0x38] sm:$0xff]   ;;  %v531_v2 = vld [vmem:[%s754_s4 + $0x30] sm:$0xff]  }
  0x26   :  { %452 = vmatprep.subr.bf16.mxu0 %v612_v0  ;;  %468 = vmatprep.mubr.msk.bf16.mxu0 %vm613_vm0, %v612_v0  ;;  %v532_v3 = vld [vmem:[%s754_s4 + $0x28] sm:$0xff]   ;;  %v533_v4 = vld [vmem:[%s754_s4 + $0x20] sm:$0xff]   ;;  %vm252_vm1 = vcmask 1045504   ;;  %vm248_vm2 = vcmask 97280   ;;  %v534_v8 = vld [vmem:[%s754_s4 + $0x18] sm:$0xff]   ;;  %vm196_vm3 = vcmask 1041408  }
  0x27   :  { %480 = vmatprep.subr.bf16.mxu1 %v612_v0  ;;  %482 = vmatprep.mubr.msk.bf16.mxu1 %vm613_vm0, %v612_v0  ;;  %v539_v5 = vld [vmem:[#allocation4] sm:$0x3f]   ;;  %v240_v7 = vld [vmem:[%s752_s2] sm:$0xf]  ;;  %v320_v10 = vld [vmem:[#allocation6 + $0x70] sm:$0xff]  ;;  %vm192_vm4 = vcmask 162816  }
  0x28   :  { %453 = vmatpush3.bf16.msra.mxu0 %v530_v1  ;;  %v254_v6 = vsel %vm252_vm1, %v539_v5, 0  ;;  %v321_v9 = vld [vmem:[#allocation6 + $0x78] sm:$0xff]  ;;  %v319_v12 = vld [vmem:[#allocation6 + $0x68] sm:$0xff]  ;;  %v318_v13 = vld [vmem:[#allocation6 + $0x60] sm:$0xff] }
  0x29   :  { %454 = vmatprep.subr.bf16.mxu0 %v612_v0  ;;  %481 = vmatpush3.bf16.msra.mxu1 %v254_v6  ;;  %v535_v11 = vld [vmem:[%s754_s4 + $0x10] sm:$0xff]   ;;  %v536_v14 = vld [vmem:[%s754_s4 + $0x8] sm:$0xff]   ;;  %v537_v17 = vld [vmem:[%s754_s4] sm:$0xff]  }
  0x2a   :  { %486 = vmatprep.subr.mxu1 %v612_v0  ;;  %v317_v15 = vld [vmem:[#allocation6 + $0x58] sm:$0xff]  ;;  %v316_v16 = vld [vmem:[#allocation6 + $0x50] sm:$0xff]  ;;  %v315_v18 = vld [vmem:[#allocation6 + $0x48] sm:$0xff] }
  0x2b   :  { %v538_v19 = vld [vmem:[#allocation2 + $0x8] ss:$0 sps:$4 sm:$0x33]   ;;  %v78_v20 = vld [vmem:[%s751_s1] sm:$0xf]  ;;  %v314_v24 = vld [vmem:[#allocation6 + $0x40] sm:$0xff] }
  0x2c   :  { %455 = vmatpush3.bf16.msra.mxu0 %v531_v2  ;;  %483 = vmatmul.mubr.msk.bf16.vlgmr.msra.gmra.mxu1 %vm248_vm2, %v240_v7  ;;  %v198_v21 = vsel %vm196_vm3, %v538_v19, 0  ;;  %v540_v22 = vld [vmem:[#allocation2] sm:$0xff]   ;;  %v313_v25 = vld [vmem:[#allocation6 + $0x38] sm:$0xff]  ;;  %v310_v28 = vld [vmem:[#allocation6 + $0x20] sm:$0xff] }
  0x2d   :  { %456 = vmatprep.subr.bf16.mxu0 %v612_v0  ;;  %487 = vmatpush3.msra.mxu1 %v321_v9  ;;  %v74_v23 = vld [vmem:[%s750_s0] sm:$0xf]  ;;  %v312_v26 = vld [vmem:[#allocation6 + $0x30] sm:$0xff]  ;;  %v309_v29 = vld [vmem:[#allocation6 + $0x18] sm:$0xff] }
  0x2e   :  { %518 = vmatprep.mubr.msk.f32.mxu1 %vm613_vm0, %v612_v0  ;;  %488 = vmatprep.subr.mxu1 %v612_v0  ;;  %v311_v27 = vld [vmem:[#allocation6 + $0x28] sm:$0xff]  ;;  %v308_v30 = vld [vmem:[#allocation6 + $0x10] sm:$0xff]  ;;  %v306_v32 = vld [vmem:[#allocation6] sm:$0xff] }
  0x2f   :  { %489 = vmatpush3.msra.mxu1 %v320_v10  ;;  %v307_v31 = vld [vmem:[#allocation6 + $0x8] sm:$0xff] }
  0x30   :  { %457 = vmatpush3.bf16.msra.mxu0 %v532_v3  ;;  %490 = vmatprep.subr.mxu1 %v612_v0  ;;  %v419_v43 = vld [vmem:[%s756_s6] ss:$0 sm:$0xff] }
  0x31   :  { %458 = vmatprep.subr.bf16.mxu0 %v612_v0  ;;  %491 = vmatpush3.msra.mxu1 %v319_v12  ;;  %v420_v50 = vld [vmem:[%s758_s8] ss:$0 sm:$0xff] }
  0x32   :  { %492 = vmatprep.subr.mxu1 %v612_v0 }
  0x33   :  { %493 = vmatpush3.msra.mxu1 %v318_v13 }
  0x34   :  { %459 = vmatpush3.bf16.msra.mxu0 %v533_v4  ;;  %494 = vmatprep.subr.mxu1 %v612_v0 }
  0x35   :  { %460 = vmatprep.subr.bf16.mxu0 %v612_v0  ;;  %495 = vmatpush3.msra.mxu1 %v317_v15 }
  0x36   :  { %496 = vmatprep.subr.mxu1 %v612_v0 }
  0x37   :  { %497 = vmatpush3.msra.mxu1 %v316_v16 }
  0x38   :  { %461 = vmatpush3.bf16.msra.mxu0 %v534_v8  ;;  %498 = vmatprep.subr.mxu1 %v612_v0 }
  0x39   :  { %462 = vmatprep.subr.bf16.mxu0 %v612_v0  ;;  %499 = vmatpush3.msra.mxu1 %v315_v18 }
  0x3a   :  { %500 = vmatprep.subr.mxu1 %v612_v0 }
  0x3b   :  { %501 = vmatpush3.msra.mxu1 %v314_v24 }
  0x3c   :  { %463 = vmatpush3.bf16.msra.mxu0 %v535_v11  ;;  %502 = vmatprep.subr.mxu1 %v612_v0 }
  0x3d   :  { %464 = vmatprep.subr.bf16.mxu0 %v612_v0  ;;  %503 = vmatpush3.msra.mxu1 %v313_v25 }
  0x3e   :  { %504 = vmatprep.subr.mxu1 %v612_v0 }
  0x3f   :  { %505 = vmatpush3.msra.mxu1 %v312_v26 }
  0x40   :  { %465 = vmatpush3.bf16.msra.mxu0 %v536_v14  ;;  %506 = vmatprep.subr.mxu1 %v612_v0 }
  0x41   :  { %466 = vmatprep.subr.bf16.mxu0 %v612_v0  ;;  %507 = vmatpush3.msra.mxu1 %v311_v27 }
  0x42   :  { %508 = vmatprep.subr.mxu1 %v612_v0 }
  0x43   :  { %509 = vmatpush3.msra.mxu1 %v310_v28 }
  0x44   :  { %467 = vmatpush3.bf16.msra.mxu0 %v537_v17  ;;  %510 = vmatprep.subr.mxu1 %v612_v0 }
  0x45   :  { %472 = vmatprep.subr.bf16.mxu0 %v612_v0  ;;  %511 = vmatpush3.msra.mxu1 %v309_v29 }
  0x46   :  { %512 = vmatprep.subr.mxu1 %v612_v0 }
  0x47   :  { %469 = vmatmul.mubr.bf16.vlgmr.msra.gmra.mxu0 %v78_v20  ;;  %513 = vmatpush3.msra.mxu1 %v308_v30 }
  0x48   :  { %473 = vmatpush3.bf16.msra.mxu0 %v198_v21  ;;  %476 = vmatprep.mubr.msk.bf16.mxu0 %vm613_vm0, %v612_v0 }
  0x49   :  { %474 = vmatprep.subr.bf16.mxu0 %v612_v0  ;;  %514 = vmatprep.subr.mxu1 %v612_v0 }
  0x4a   :  { %515 = vmatpush3.msra.mxu1 %v307_v31 }
  0x4b   :  { %516 = vmatprep.subr.mxu1 %v612_v0 }
  0x4c   :  { %475 = vmatpush3.bf16.msra.mxu0 %v540_v22  ;;  %517 = vmatpush3.msra.mxu1 %v306_v32 }
  0x4f   :  { %477 = vmatmul.mubr.msk.bf16.vlgmr.msra.gmra.mxu0 %vm192_vm4, %v74_v23 }
  0xec   :  { %v290_v33 = vpop.f32.mrf.mxu1 }
  0xee   :  { %v484_v34 = vpop.f32.mrf.mxu1 }
  0xf0   :  { %v293_v35 = vpop.f32.mrf.mxu1 }
  0xf2   :  { %v485_v36 = vpop.f32.mrf.mxu1 }
 0x107   :  { %v177_v37 = vpop.f32.mrf.mxu0 }
 0x109   :  { %v470_v38 = vpop.f32.mrf.mxu0 }
 0x10b   :  { %v180_v39 = vpop.f32.mrf.mxu0 }
 0x10d   :  { %v471_v40 = vpop.f32.mrf.mxu0 }
 0x10f   :  { %v234_v41 = vpop.f32.mrf.mxu0 }
 0x110   :  { %v235_v42 = vadd.f32 %v234_v41, %v177_v37 }
 0x111   :  { %v478_v44 = vpop.f32.mrf.mxu0 }
 0x112   :  { %v296_v45 = vadd.f32 %v290_v33, %v235_v42 }
 0x113   :  { %v237_v46 = vpop.f32.mrf.mxu0 }
 0x114   :  { %v304_v47 = vadd.f32 %v419_v43, %v296_v45 }
 0x115   :  { %v479_v48 = vpop.f32.mrf.mxu0 }
 0x116   :  { %v305_v49 = vmax.f32 %v304_v47, 0.0 }
 0x118   :  { %519 = vmatmul.mubr.f32.vlgmr.msra.gmra.mxu1 %v305_v49 }
 0x1d8   :  { %v395_v51 = vpop.f32.mrf.mxu1 }
 0x1d9   :  { %v396_v52 = vadd.f32 %v420_v50, %v395_v51 }
 0x1da   :  { %v520_v53 = vpop.f32.mrf.mxu1 }
 0x1db   :  { %399 = vst [vmem:[%s759_s9] sm:$0xff] %v396_v52 }
 0x1dc   :  { %404 = vsyncpa [#allocation3], 1 }
 0x1dd   :  { %405 = vsyncpa [#allocation5], 1 }

</bundles_post_ra>
